<compile_context>
chip_gen: v7x
topology: tpu7x:2x2x1
jax: 0.10.0
libtpu: 0.0.40
codegen_flags: <defaults>
</compile_context>

<pallas_src>
import jax
import jax.numpy as jnp
from jax.experimental import pallas as pl
from jax.experimental.pallas import tpu as pltpu

_MIB = 1024 * 1024


def _round_up(x, m):
    return ((x + m - 1) // m) * m


# ---------------------------------------------------------------------------
# Kernel: one (tm, D) row tile; grid = (row_tiles, hidden_chunks)
# ---------------------------------------------------------------------------
def _ffn_kernel(x_ref, gamma_ref, beta_ref, w1_ref, b1_ref, w2_ref, b2_ref,
                o_ref, xn_ref, acc_ref):
    k = pl.program_id(1)

    # ---- LayerNorm (f32 stats), once per row tile, cached in VMEM ----
    @pl.when(k == 0)
    def _():
        x = x_ref[...].astype(jnp.float32)                      # (tm, D)
        mean = jnp.mean(x, axis=-1, keepdims=True)
        xc = x - mean
        var = jnp.mean(xc * xc, axis=-1, keepdims=True)
        inv = jax.lax.rsqrt(var + 1e-5)                         # torch default eps
        xn = xc * inv * gamma_ref[...].astype(jnp.float32) \
            + beta_ref[...].astype(jnp.float32)
        xn_ref[...] = xn.astype(xn_ref.dtype)                   # MXU-native dtype
        acc_ref[...] = jnp.zeros_like(acc_ref)

    # ---- Linear(dim -> hidden chunk) + ReLU; accumulate chunk @ w2 in f32 ----
    h = jnp.dot(xn_ref[...], w1_ref[...], preferred_element_type=jnp.float32)
    h = jnp.maximum(h + b1_ref[...].astype(jnp.float32), 0.0)
    acc_ref[...] += jnp.dot(h.astype(w2_ref.dtype), w2_ref[...],
                            preferred_element_type=jnp.float32)

    # ---- Finalize on the last hidden chunk ----
    @pl.when(k == pl.num_programs(1) - 1)
    def _():
        o_ref[...] = (acc_ref[...] + b2_ref[...].astype(jnp.float32)).astype(o_ref.dtype)


# ---------------------------------------------------------------------------
# Generation-aware configuration
# ---------------------------------------------------------------------------
def _generation_config():
    """Returns (row-tile target, hidden-tile preference order, VMEM budget bytes)."""
    kind = ""
    try:
        kind = jax.devices()[0].device_kind.lower()
    except Exception:
        pass
    vmem_cap = None
    try:
        vmem_cap = int(pltpu.get_tpu_info().vmem_capacity_bytes)
    except Exception:
        vmem_cap = None

    is_v7x = ("v7" in kind) or ("7x" in kind) or (
        vmem_cap is not None and vmem_cap <= 80 * _MIB)
    is_v5 = ("v5" in kind) and not is_v7x

    if is_v7x:
        # 64 MiB VMEM/TC, 2 TCs share HBM, AI roofline ~310 flops/byte:
        # moderate row tile, th=256 first, cap scoped VMEM well below 64 MiB.
        if vmem_cap is None:
            vmem_cap = 64 * _MIB
        budget = max(min(vmem_cap - 12 * _MIB, 52 * _MIB), vmem_cap // 2)
        return 512, (256, 512, 128), budget
    if vmem_cap is None:
        vmem_cap = 128 * _MIB
    budget = max(min(vmem_cap - 24 * _MIB, 104 * _MIB), vmem_cap // 2)
    if is_v5:
        # 197 TF/s roofline: tm=512 is already compute-bound on streamed weights.
        return 512, (512, 256, 128), budget
    # v6e (default): needs AI ~650-715 flops/byte on streamed bf16 weights.
    return 1024, (512, 256, 128), budget


def _vmem_estimate(tm, th, D, esize, csize, wsize):
    act = 2 * tm * D * esize       # x tile (double-buffered)
    act += 2 * tm * D * esize      # out tile (double-buffered)
    act += tm * D * csize          # cached normalized rows (scratch)
    act += tm * D * 4              # f32 accumulator (scratch)
    wgt = 2 * 2 * D * th * wsize   # w1 + w2 chunks (double-buffered)
    vec = 4 * (3 * D + th) * max(esize, wsize)   # gamma/beta/b1/b2 (tiny)
    tmp = tm * th * 4              # f32 hidden intermediate
    return act + wgt + vec + tmp


def _choose_tiles(M, D, H, esize, csize, wsize, tm_target, th_prefs, vmem_budget):
    """Pick (row tile, hidden tile).  Prefers full-H weight residency."""
    fit_budget = int(vmem_budget * 0.9)
    tm_cap = min(tm_target, _round_up(M, 8))     # multiple of 8 (sublane aligned)

    cands = []
    t = tm_cap
    while t >= 128:
        cands.append(t)
        t //= 2
    if not cands:
        cands = [tm_cap]

    def fits(tm, th):
        return _vmem_estimate(tm, th, D, esize, csize, wsize) <= fit_budget

    # (1) Full-H residency: weight block index constant over the whole grid, so
    #     w1/w2 are DMA'd from HBM exactly once.  Don't shrink the row tile
    #     below 256 just to get residency (hurts MXU row utilization).
    # TODO(synk): pipeline_mode=pl.Buffered(1) on the weight BlockSpecs would
    #     halve the resident footprint and extend this path to larger weights.
    for tm in cands:
        if tm < 256 and tm != cands[0]:
            break
        if fits(tm, H):
            return tm, H

    # (2) Stream the hidden dim in lane-aligned chunks that divide H exactly
    #     (a ragged hidden chunk would leak garbage into the accumulator).
    th = next((t for t in th_prefs if H % t == 0), H)
    for tm in cands:
        if fits(tm, th):
            return tm, th
    return cands[-1], th


# ---------------------------------------------------------------------------
# Public wrapper
# ---------------------------------------------------------------------------
def feed_forward(x, gamma, beta, w1, b1, w2, b2, *, compute_dtype=None):
    """Fused LayerNorm -> Linear -> ReLU -> Linear.

    x: (batch, seq, dim); w1: (dim, hidden); w2: (hidden, dim).
    compute_dtype: optional MXU dtype (e.g. jnp.bfloat16); None preserves x.dtype.
    Returns (batch, seq, dim) in x.dtype.
    """
    B, S, D = x.shape
    H = w1.shape[1]
    M = B * S

    cdt = jnp.dtype(compute_dtype) if compute_dtype is not None else jnp.dtype(x.dtype)
    if w1.dtype != cdt:
        w1 = w1.astype(cdt)          # one-time host cast; also halves weight HBM traffic
    if w2.dtype != cdt:
        w2 = w2.astype(cdt)

    esize = jnp.dtype(x.dtype).itemsize
    csize = cdt.itemsize
    wsize = cdt.itemsize

    tm_target, th_prefs, vmem_limit = _generation_config()
    tm, th = _choose_tiles(M, D, H, esize, csize, wsize, tm_target, th_prefs, vmem_limit)
    n_rows = pl.cdiv(M, tm)          # ragged tail handled by boundary blocks (no pad)
    n_h = H // th                    # th always divides H by construction

    x2 = x.reshape(M, D)             # free (contiguous) reshape, no extra HBM pass
    gamma2 = gamma.reshape(1, D)
    beta2 = beta.reshape(1, D)
    b1_2 = b1.reshape(1, H)
    b2_2 = b2.reshape(1, D)

    # Advisory cost: weights re-stream once per row tile unless fully resident.
    weight_passes = 1 if n_h == 1 else n_rows
    cost = pl.CostEstimate(
        flops=int(4 * M * D * H + 8 * M * D),
        transcendentals=int(M),
        bytes_accessed=int(2 * M * D * esize
                           + weight_passes * 2 * D * H * wsize
                           + 2 * D * esize + (H + D) * wsize))

    out = pl.pallas_call(
        _ffn_kernel,
        out_shape=jax.ShapeDtypeStruct((M, D), x.dtype),
        grid_spec=pltpu.PrefetchScalarGridSpec(
            num_scalar_prefetch=0,
            grid=(n_rows, n_h),
            in_specs=[
                pl.BlockSpec((tm, D), lambda i, k: (i, 0)),    # x rows
                pl.BlockSpec((1, D), lambda i, k: (0, 0)),     # gamma
                pl.BlockSpec((1, D), lambda i, k: (0, 0)),     # beta
                pl.BlockSpec((D, th), lambda i, k: (0, k)),    # w1 chunk
                pl.BlockSpec((1, th), lambda i, k: (0, k)),    # b1 chunk
                pl.BlockSpec((th, D), lambda i, k: (k, 0)),    # w2 chunk
                pl.BlockSpec((1, D), lambda i, k: (0, 0)),     # b2
            ],
            out_specs=pl.BlockSpec((tm, D), lambda i, k: (i, 0)),
            scratch_shapes=[
                pltpu.VMEM((tm, D), cdt),          # cached normalized rows
                pltpu.VMEM((tm, D), jnp.float32),  # f32 output accumulator
            ],
        ),
        compiler_params=pltpu.CompilerParams(
            dimension_semantics=("parallel", "arbitrary"),
            vmem_limit_bytes=int(vmem_limit)),
        cost_estimate=cost,
    )(x2, gamma2, beta2, w1, b1_2, w2, b2_2)

    return out.reshape(B, S, D)


def _reference(x, gamma, beta, w1, b1, w2, b2):
    xf = x.astype(jnp.float32)
    mean = jnp.mean(xf, axis=-1, keepdims=True)
    var = jnp.mean((xf - mean) ** 2, axis=-1, keepdims=True)
    xn = (xf - mean) * jax.lax.rsqrt(var + 1e-5) * gamma + beta
    h = jnp.maximum(xn @ w1 + b1, 0.0)
    return (h @ w2 + b2).astype(x.dtype)


if __name__ == "__main__":
    # Small shapes consistent with the module: (batch, seq, dim)
    batch, seq, dim, hidden = 2, 8, 32, 64

    key = jax.random.PRNGKey(0)
    kx, k1, k2, k3, k4 = jax.random.split(key, 5)

    x = jax.random.normal(kx, (batch, seq, dim), dtype=jnp.float32)

    # LayerNorm params (torch default init: ones / zeros)
    gamma = jnp.ones((dim,), jnp.float32)
    beta = jnp.zeros((dim,), jnp.float32)

    # Linear params, deterministic uniform init (torch-like bound 1/sqrt(fan_in))
    bnd1 = 1.0 / jnp.sqrt(dim)
    w1 = jax.random.uniform(k1, (dim, hidden), jnp.float32, -bnd1, bnd1)
    b1 = jax.random.uniform(k2, (hidden,), jnp.float32, -bnd1, bnd1)
    bnd2 = 1.0 / jnp.sqrt(hidden)
    w2 = jax.random.uniform(k3, (hidden, dim), jnp.float32, -bnd2, bnd2)
    b2 = jax.random.uniform(k4, (dim,), jnp.float32, -bnd2, bnd2)

    y = jax.block_until_ready(feed_forward(x, gamma, beta, w1, b1, w2, b2))
    y_ref = _reference(x, gamma, beta, w1, b1, w2, b2)

    assert y.shape == x.shape
    assert jnp.allclose(y, y_ref, atol=1e-5, rtol=1e-5), "mismatch vs reference"

    print("KERNEL_OK")
</pallas_src>

<mosaic_0001>
module attributes {stable_mosaic.version = 11 : i64} {
  func.func @_ffn_kernel(%arg0: i32, %arg1: i32, %arg2: memref<16x32xf32, #tpu.memory_space<vmem>>, %arg3: memref<1x32xf32, #tpu.memory_space<vmem>>, %arg4: memref<1x32xf32, #tpu.memory_space<vmem>>, %arg5: memref<32x64xf32, #tpu.memory_space<vmem>>, %arg6: memref<1x64xf32, #tpu.memory_space<vmem>>, %arg7: memref<64x32xf32, #tpu.memory_space<vmem>>, %arg8: memref<1x32xf32, #tpu.memory_space<vmem>>, %arg9: memref<16x32xf32, #tpu.memory_space<vmem>>, %arg10: memref<16x32xf32, #tpu.memory_space<vmem>>, %arg11: memref<16x32xf32, #tpu.memory_space<vmem>>) attributes {dimension_semantics = [#tpu.dimension_semantics<parallel>, #tpu.dimension_semantics<arbitrary>], iteration_bounds = array<i64: 1, 1>, scalar_prefetch = 0 : i64, scratch_operands = 2 : i64, tpu.core_type = #tpu.core_type<tc>, window_params = [{transform_indices = @transform_0, window_bounds = array<i64: 16, 32>}, {pipeline_mode = #tpu.pipeline_mode<synchronous>, transform_indices = @transform_1, window_bounds = array<i64: 1, 32>}, {pipeline_mode = #tpu.pipeline_mode<synchronous>, transform_indices = @transform_2, window_bounds = array<i64: 1, 32>}, {transform_indices = @transform_3, window_bounds = array<i64: 32, 64>}, {transform_indices = @transform_4, window_bounds = array<i64: 1, 64>}, {transform_indices = @transform_5, window_bounds = array<i64: 64, 32>}, {pipeline_mode = #tpu.pipeline_mode<synchronous>, transform_indices = @transform_6, window_bounds = array<i64: 1, 32>}, {transform_indices = @transform_7, window_bounds = array<i64: 16, 32>}]} {
    %c0_i32 = arith.constant 0 : i32
    %0 = arith.cmpi eq, %arg1, %c0_i32 : i32
    %1 = arith.extui %0 : i1 to i32
    %c0_i32_0 = arith.constant 0 : i32
    %2 = arith.cmpi ne, %1, %c0_i32_0 : i32
    scf.if %2 {
      %c0_16 = arith.constant 0 : index
      %c0_17 = arith.constant 0 : index
      %19 = vector.load %arg2[%c0_16, %c0_17] : memref<16x32xf32, #tpu.memory_space<vmem>>, vector<16x32xf32>
      %cst_18 = arith.constant dense<0.000000e+00> : vector<16xf32>
      %20 = vector.multi_reduction <add>, %19, %cst_18 [1] : vector<16x32xf32> to vector<16xf32>
      %21 = vector.shape_cast %20 : vector<16xf32> to vector<16x1xf32>
      %cst_19 = arith.constant 3.200000e+01 : f32
      %22 = vector.broadcast %cst_19 : f32 to vector<16x1xf32>
      %23 = arith.divf %21, %22 : vector<16x1xf32>
      %24 = vector.broadcast %23 : vector<16x1xf32> to vector<16x32xf32>
      %25 = arith.subf %19, %24 : vector<16x32xf32>
      %26 = arith.mulf %25, %25 : vector<16x32xf32>
      %cst_20 = arith.constant dense<0.000000e+00> : vector<16xf32>
      %27 = vector.multi_reduction <add>, %26, %cst_20 [1] : vector<16x32xf32> to vector<16xf32>
      %28 = vector.shape_cast %27 : vector<16xf32> to vector<16x1xf32>
      %cst_21 = arith.constant 3.200000e+01 : f32
      %29 = vector.broadcast %cst_21 : f32 to vector<16x1xf32>
      %30 = arith.divf %28, %29 : vector<16x1xf32>
      %cst_22 = arith.constant 9.99999974E-6 : f32
      %31 = vector.broadcast %cst_22 : f32 to vector<16x1xf32>
      %32 = arith.addf %30, %31 : vector<16x1xf32>
      %33 = math.rsqrt %32 : vector<16x1xf32>
      %34 = vector.broadcast %33 : vector<16x1xf32> to vector<16x32xf32>
      %35 = arith.mulf %25, %34 : vector<16x32xf32>
      %c0_23 = arith.constant 0 : index
      %c0_24 = arith.constant 0 : index
      %36 = vector.load %arg3[%c0_23, %c0_24] : memref<1x32xf32, #tpu.memory_space<vmem>>, vector<1x32xf32>
      %37 = vector.broadcast %36 : vector<1x32xf32> to vector<16x32xf32>
      %38 = arith.mulf %35, %37 : vector<16x32xf32>
      %c0_25 = arith.constant 0 : index
      %c0_26 = arith.constant 0 : index
      %39 = vector.load %arg4[%c0_25, %c0_26] : memref<1x32xf32, #tpu.memory_space<vmem>>, vector<1x32xf32>
      %40 = vector.broadcast %39 : vector<1x32xf32> to vector<16x32xf32>
      %41 = arith.addf %38, %40 : vector<16x32xf32>
      %c0_27 = arith.constant 0 : index
      %c0_28 = arith.constant 0 : index
      %42 = vector.load %arg10[%c0_27, %c0_28] : memref<16x32xf32, #tpu.memory_space<vmem>>, vector<16x32xf32>
      tpu.vector_store %arg10[%c0_27, %c0_28], %41 {strides = array<i32>} : memref<16x32xf32, #tpu.memory_space<vmem>>, vector<16x32xf32>,
      %cst_29 = arith.constant 0.000000e+00 : f32
      %43 = vector.broadcast %cst_29 : f32 to vector<16x32xf32>
      %c0_30 = arith.constant 0 : index
      %c0_31 = arith.constant 0 : index
      %44 = vector.load %arg11[%c0_30, %c0_31] : memref<16x32xf32, #tpu.memory_space<vmem>>, vector<16x32xf32>
      tpu.vector_store %arg11[%c0_30, %c0_31], %43 {strides = array<i32>} : memref<16x32xf32, #tpu.memory_space<vmem>>, vector<16x32xf32>,
    } else {
    }
    %c0 = arith.constant 0 : index
    %c0_1 = arith.constant 0 : index
    %3 = vector.load %arg10[%c0, %c0_1] : memref<16x32xf32, #tpu.memory_space<vmem>>, vector<16x32xf32>
    %c0_2 = arith.constant 0 : index
    %c0_3 = arith.constant 0 : index
    %4 = vector.load %arg5[%c0_2, %c0_3] : memref<32x64xf32, #tpu.memory_space<vmem>>, vector<32x64xf32>
    %cst = arith.constant dense<0.000000e+00> : vector<16x64xf32>
    %5 = tpu.matmul %3, %4, %cst {dimension_numbers = #tpu.dot_dimension_numbers<[1], [0], [0], [1], [0, 0, 1, 1], [], []>} : vector<16x32xf32>, vector<32x64xf32>, vector<16x64xf32> -> vector<16x64xf32>
    %c0_4 = arith.constant 0 : index
    %c0_5 = arith.constant 0 : index
    %6 = vector.load %arg6[%c0_4, %c0_5] : memref<1x64xf32, #tpu.memory_space<vmem>>, vector<1x64xf32>
    %7 = vector.broadcast %6 : vector<1x64xf32> to vector<16x64xf32>
    %8 = arith.addf %5, %7 : vector<16x64xf32>
    %cst_6 = arith.constant 0.000000e+00 : f32
    %9 = vector.broadcast %cst_6 : f32 to vector<16x64xf32>
    %10 = arith.maximumf %8, %9 : vector<16x64xf32>
    %c0_7 = arith.constant 0 : index
    %c0_8 = arith.constant 0 : index
    %11 = vector.load %arg11[%c0_7, %c0_8] : memref<16x32xf32, #tpu.memory_space<vmem>>, vector<16x32xf32>
    %c0_9 = arith.constant 0 : index
    %c0_10 = arith.constant 0 : index
    %12 = vector.load %arg7[%c0_9, %c0_10] : memref<64x32xf32, #tpu.memory_space<vmem>>, vector<64x32xf32>
    %cst_11 = arith.constant dense<0.000000e+00> : vector<16x32xf32>
    %13 = tpu.matmul %10, %12, %cst_11 {dimension_numbers = #tpu.dot_dimension_numbers<[1], [0], [0], [1], [0, 0, 1, 1], [], []>} : vector<16x64xf32>, vector<64x32xf32>, vector<16x32xf32> -> vector<16x32xf32>
    %14 = arith.addf %11, %13 : vector<16x32xf32>
    %c0_12 = arith.constant 0 : index
    %c0_13 = arith.constant 0 : index
    %15 = vector.load %arg11[%c0_12, %c0_13] : memref<16x32xf32, #tpu.memory_space<vmem>>, vector<16x32xf32>
    tpu.vector_store %arg11[%c0_12, %c0_13], %14 {strides = array<i32>} : memref<16x32xf32, #tpu.memory_space<vmem>>, vector<16x32xf32>,
    %c0_i32_14 = arith.constant 0 : i32
    %16 = arith.cmpi eq, %arg1, %c0_i32_14 : i32
    %17 = arith.extui %16 : i1 to i32
    %c0_i32_15 = arith.constant 0 : i32
    %18 = arith.cmpi ne, %17, %c0_i32_15 : i32
    scf.if %18 {
      %c0_16 = arith.constant 0 : index
      %c0_17 = arith.constant 0 : index
      %19 = vector.load %arg11[%c0_16, %c0_17] : memref<16x32xf32, #tpu.memory_space<vmem>>, vector<16x32xf32>
      %c0_18 = arith.constant 0 : index
      %c0_19 = arith.constant 0 : index
      %20 = vector.load %arg8[%c0_18, %c0_19] : memref<1x32xf32, #tpu.memory_space<vmem>>, vector<1x32xf32>
      %21 = vector.broadcast %20 : vector<1x32xf32> to vector<16x32xf32>
      %22 = arith.addf %19, %21 : vector<16x32xf32>
      %c0_20 = arith.constant 0 : index
      %c0_21 = arith.constant 0 : index
      %23 = vector.load %arg9[%c0_20, %c0_21] : memref<16x32xf32, #tpu.memory_space<vmem>>, vector<16x32xf32>
      tpu.vector_store %arg9[%c0_20, %c0_21], %22 {strides = array<i32>} : memref<16x32xf32, #tpu.memory_space<vmem>>, vector<16x32xf32>,
    } else {
    }
    return
  }
  func.func @transform_0(%arg0: i32, %arg1: i32) -> (i32, i32) {
    %c0_i32 = arith.constant 0 : i32
    %c0_i32_0 = arith.constant 0 : i32
    return %arg0, %c0_i32 : i32, i32
  }
  func.func @transform_1(%arg0: i32, %arg1: i32) -> (i32, i32) {
    %c0_i32 = arith.constant 0 : i32
    %c0_i32_0 = arith.constant 0 : i32
    %c0_i32_1 = arith.constant 0 : i32
    return %c0_i32, %c0_i32_0 : i32, i32
  }
  func.func @transform_2(%arg0: i32, %arg1: i32) -> (i32, i32) {
    %c0_i32 = arith.constant 0 : i32
    %c0_i32_0 = arith.constant 0 : i32
    %c0_i32_1 = arith.constant 0 : i32
    return %c0_i32, %c0_i32_0 : i32, i32
  }
  func.func @transform_3(%arg0: i32, %arg1: i32) -> (i32, i32) {
    %c0_i32 = arith.constant 0 : i32
    %c0_i32_0 = arith.constant 0 : i32
    return %c0_i32, %arg1 : i32, i32
  }
  func.func @transform_4(%arg0: i32, %arg1: i32) -> (i32, i32) {
    %c0_i32 = arith.constant 0 : i32
    %c0_i32_0 = arith.constant 0 : i32
    return %c0_i32, %arg1 : i32, i32
  }
  func.func @transform_5(%arg0: i32, %arg1: i32) -> (i32, i32) {
    %c0_i32 = arith.constant 0 : i32
    %c0_i32_0 = arith.constant 0 : i32
    return %arg1, %c0_i32 : i32, i32
  }
  func.func @transform_6(%arg0: i32, %arg1: i32) -> (i32, i32) {
    %c0_i32 = arith.constant 0 : i32
    %c0_i32_0 = arith.constant 0 : i32
    %c0_i32_1 = arith.constant 0 : i32
    return %c0_i32, %c0_i32_0 : i32, i32
  }
  func.func @transform_7(%arg0: i32, %arg1: i32) -> (i32, i32) {
    %c0_i32 = arith.constant 0 : i32
    %c0_i32_0 = arith.constant 0 : i32
    return %arg0, %c0_i32 : i32, i32
  }
}

</mosaic_0001>

<bundles_post_ra>
// kernel: tpu_custom_call.1
= control target key start
LH: loop header
LB: loop body
LE: loop exit
PB: predicated region body
PF: predicated region fallthrough
CT: control target
= control target key end

     0   :  { %12 = vsyncpa [#allocation5], 0  ;;  %s851_s0 = inlined_call_operand.hbm [shape: f32[16,32], index: 0, kind: input, shape index: {}]   ;;  %s852_s1 = inlined_call_operand.hbm [shape: f32[1,32], index: 1, kind: input, shape index: {}]   ;;  %s853_s2 = inlined_call_operand.hbm [shape: f32[1,32], index: 2, kind: input, shape index: {}]   ;;  %s854_s3 = inlined_call_operand.hbm [shape: f32[32,64], index: 3, kind: input, shape index: {}]   ;;  %s855_s4 = inlined_call_operand.hbm [shape: f32[1,64], index: 4, kind: input, shape index: {}]   ;;  %s856_s5 = inlined_call_operand.hbm [shape: f32[64,32], index: 5, kind: input, shape index: {}]   ;;  %s857_s6 = inlined_call_operand.hbm [shape: f32[1,32], index: 6, kind: input, shape index: {}]   ;;  %s858_s7 = inlined_call_operand.hbm [shape: f32[16,32], index: 7, kind: output, shape index: {}]  }
   0x1   :  { %13 = vsyncpa [#allocation8], 0 }
   0x2   :  { %14 = vsyncpa [#allocation11], 0 }
   0x3   :  { %15 = vsyncpa [#allocation14], 0 }
   0x4   :  { %16 = vsyncpa [#allocation6], 0  ;;  %s678_s24 = smov [#allocation7]   ;;  %s492_s28 = scalar_lea.hbm %s852_s1, 16 }
   0x5   :  { %s35_s25 = sshll.u32 %s678_s24, 4  ;;  %p493_p0 = scmp.ne.s32.totalorder %s852_s1, %s492_s28  ;;  %s36_s25 = int_to_ptr.vmem [resolvable:$true] %s35_s25 }
   0x6   :  { %p496_p1 = scmp.lt.u32.totalorder %s492_s28, %s852_s1 }
   0x8   :  { %p498_p2 = pnand %p496_p1, %p493_p0 }
   0xa   :  { %501 = shalt.err (!%p498_p2)
}
   0xb   :  { %s502_s10 = scalar_lea.vmem %s36_s25, 16  ;;  %s506_s11 = scalar_lea.vmem %s36_s25, 32 }
   0xc   :  { %p503_p3 = scmp.ne.s32.totalorder %s36_s25, %s502_s10  ;;  %p507_p4 = scmp.lt.s32.totalorder %s36_s25, %s36_s25 }
   0xd   :  { %p508_p5 = scmp.lt.s32.totalorder %s506_s11, %s502_s10 }
   0xf   :  { %p509_p6 = por %p508_p5, %p507_p4 }
  0x11   :  { %p510_p7 = pnand %p509_p6, %p503_p3 }
  0x13   :  { %513 = shalt.err (!%p510_p7)
}
  0x14   :  { %38 = dma.hbm_to_vmem [thread:$0]  %s852_s1, 16, %s36_s25, [#allocation8]  }
  0x15   :  { %s679_s14 = smov [#allocation10]   ;;  %s680_s16 = smov [#allocation13]  }
  0x16   :  { %s54_s15 = sshll.u32 %s679_s14, 4  ;;  %s76_s17 = sshll.u32 %s680_s16, 4  ;;  %s55_s15 = int_to_ptr.vmem [resolvable:$true] %s54_s15  ;;  %s77_s17 = int_to_ptr.vmem [resolvable:$true] %s76_s17 }
  0x17   :  { %s514_s20 = scalar_lea.hbm %s854_s3, 512 }
  0x18   :  { %p515_p8 = scmp.ne.s32.totalorder %s854_s3, %s514_s20  ;;  %p518_p9 = scmp.lt.u32.totalorder %s514_s20, %s854_s3 }
  0x1a   :  { %p520_p10 = pnand %p518_p9, %p515_p8 }
  0x1c   :  { %523 = shalt.err (!%p520_p10)
}
  0x1d   :  { %s524_s1 = scalar_lea.vmem %s55_s15, 512  ;;  %p529_p12 = scmp.lt.s32.totalorder %s55_s15, %s55_s15 }
  0x1e   :  { %p525_p11 = scmp.ne.s32.totalorder %s55_s15, %s524_s1  ;;  %p530_p13 = scmp.lt.s32.totalorder %s524_s1, %s524_s1 }
  0x20   :  { %p531_p0 = por %p530_p13, %p529_p12 }
  0x22   :  { %p532_p1 = pnand %p531_p0, %p525_p11 }
  0x24   :  { %535 = shalt.err (!%p532_p1)
}
  0x25   :  { %s681_s25 = smov 128   ;;  %s682_s26 = smov 8  }
  0x26   :  { %60 = dma.hbm_to_vmem [thread:$0]  %s854_s3, 512, %s55_s15, [#allocation11], %s681_s25, %s681_s25, %s682_s26  }
  0x27   :  { %s536_s8 = scalar_lea.hbm %s856_s5, 1024 }
  0x28   :  { %p537_p2 = scmp.ne.s32.totalorder %s856_s5, %s536_s8  ;;  %p540_p3 = scmp.lt.u32.totalorder %s536_s8, %s856_s5 }
  0x2a   :  { %p542_p4 = pnand %p540_p3, %p537_p2 }
  0x2c   :  { %545 = shalt.err (!%p542_p4)
}
  0x2d   :  { %s546_s13 = scalar_lea.vmem %s77_s17, 1024  ;;  %p551_p6 = scmp.lt.s32.totalorder %s77_s17, %s77_s17 }
  0x2e   :  { %p547_p5 = scmp.ne.s32.totalorder %s77_s17, %s546_s13  ;;  %p552_p7 = scmp.lt.s32.totalorder %s546_s13, %s546_s13 }
  0x30   :  { %p553_p8 = por %p552_p7, %p551_p6 }
  0x32   :  { %p554_p9 = pnand %p553_p8, %p547_p5 }
  0x34   :  { %557 = shalt.err (!%p554_p9)
}
  0x35   :  { %82 = dma.hbm_to_vmem [thread:$0]  %s856_s5, 1024, %s77_s17, [#allocation14], %s681_s25, %s681_s25, %s682_s26  }
  0x36   :  { %s683_s15 = smov [#allocation4]   ;;  %s684_s18 = smov [#allocation9]  }
  0x37   :  { %s22_s16 = sshll.u32 %s683_s15, 4  ;;  %s45_s19 = sshll.u32 %s684_s18, 4  ;;  %s23_s16 = int_to_ptr.vmem [resolvable:$true] %s22_s16  ;;  %s46_s19 = int_to_ptr.vmem [resolvable:$true] %s45_s19 }
  0x38   :  { %s558_s22 = scalar_lea.hbm %s851_s0, 256 }
  0x39   :  { %p559_p10 = scmp.ne.s32.totalorder %s851_s0, %s558_s22  ;;  %p562_p11 = scmp.lt.u32.totalorder %s558_s22, %s851_s0 }
  0x3b   :  { %p564_p12 = pnand %p562_p11, %p559_p10 }
  0x3d   :  { %567 = shalt.err (!%p564_p12)
}
  0x3e   :  { %s568_s5 = scalar_lea.vmem %s23_s16, 256  ;;  %p573_p0 = scmp.lt.s32.totalorder %s23_s16, %s23_s16 }
  0x3f   :  { %p569_p13 = scmp.ne.s32.totalorder %s23_s16, %s568_s5  ;;  %p574_p1 = scmp.lt.s32.totalorder %s568_s5, %s568_s5 }
  0x41   :  { %p575_p2 = por %p574_p1, %p573_p0 }
  0x43   :  { %p576_p3 = pnand %p575_p2, %p569_p13 }
  0x45   :  { %579 = shalt.err (!%p576_p3)
}
  0x46   :  { %28 = dma.hbm_to_vmem [thread:$0]  %s851_s0, 256, %s23_s16, [#allocation5], %s681_s25, %s681_s25, %s682_s26  }
  0x47   :  { %s580_s8 = scalar_lea.hbm %s853_s2, 16 }
  0x48   :  { %p581_p4 = scmp.ne.s32.totalorder %s853_s2, %s580_s8  ;;  %p584_p5 = scmp.lt.u32.totalorder %s580_s8, %s853_s2 }
  0x4a   :  { %p586_p6 = pnand %p584_p5, %p581_p4 }
  0x4c   :  { %589 = shalt.err (!%p586_p6)
}
  0x4d   :  { %s590_s13 = scalar_lea.vmem %s46_s19, 16  ;;  %s594_s3 = scalar_lea.vmem %s46_s19, 32 }
  0x4e   :  { %p591_p7 = scmp.ne.s32.totalorder %s46_s19, %s590_s13  ;;  %p595_p8 = scmp.lt.s32.totalorder %s46_s19, %s46_s19 }
  0x4f   :  { %p596_p9 = scmp.lt.s32.totalorder %s594_s3, %s590_s13 }
  0x51   :  { %p597_p10 = por %p596_p9, %p595_p8 }
  0x53   :  { %p598_p11 = pnand %p597_p10, %p591_p7 }
  0x55   :  { %601 = shalt.err (!%p598_p11)
}
  0x56   :  { %48 = dma.hbm_to_vmem [thread:$0]  %s853_s2, 16, %s46_s19, [#allocation8]  }
  0x57   :  { %s685_s15 = smov [#allocation12]   ;;  %s686_s18 = smov [#allocation15]  }
  0x58   :  { %s67_s16 = sshll.u32 %s685_s15, 4  ;;  %s89_s20 = sshll.u32 %s686_s18, 4  ;;  %s68_s16 = int_to_ptr.vmem [resolvable:$true] %s67_s16  ;;  %s90_s20 = int_to_ptr.vmem [resolvable:$true] %s89_s20 }
  0x59   :  { %s602_s23 = scalar_lea.hbm %s855_s4, 16 }
  0x5a   :  { %p603_p12 = scmp.ne.s32.totalorder %s855_s4, %s602_s23  ;;  %p606_p13 = scmp.lt.u32.totalorder %s602_s23, %s855_s4 }
  0x5c   :  { %p608_p0 = pnand %p606_p13, %p603_p12 }
  0x5e   :  { %611 = shalt.err (!%p608_p0)
}
  0x5f   :  { %s612_s2 = scalar_lea.vmem %s68_s16, 16  ;;  %s616_s19 = scalar_lea.vmem %s68_s16, 32 }
  0x60   :  { %p613_p1 = scmp.ne.s32.totalorder %s68_s16, %s612_s2  ;;  %p617_p2 = scmp.lt.s32.totalorder %s68_s16, %s68_s16 }
  0x61   :  { %p618_p3 = scmp.lt.s32.totalorder %s616_s19, %s612_s2 }
  0x63   :  { %p619_p4 = por %p618_p3, %p617_p2 }
  0x65   :  { %p620_p5 = pnand %p619_p4, %p613_p1 }
  0x67   :  { %623 = shalt.err (!%p620_p5)
}
  0x68   :  { %70 = dma.hbm_to_vmem [thread:$0]  %s855_s4, 16, %s68_s16, [#allocation11]  }
  0x69   :  { %s624_s8 = scalar_lea.hbm %s857_s6, 16 }
  0x6a   :  { %p625_p6 = scmp.ne.s32.totalorder %s857_s6, %s624_s8  ;;  %p628_p7 = scmp.lt.u32.totalorder %s624_s8, %s857_s6 }
  0x6c   :  { %p630_p8 = pnand %p628_p7, %p625_p6 }
  0x6e   :  { %633 = shalt.err (!%p630_p8)
}
  0x6f   :  { %s634_s13 = scalar_lea.vmem %s90_s20, 16  ;;  %s638_s3 = scalar_lea.vmem %s90_s20, 32 }
  0x70   :  { %p635_p9 = scmp.ne.s32.totalorder %s90_s20, %s634_s13  ;;  %p639_p10 = scmp.lt.s32.totalorder %s90_s20, %s90_s20 }
  0x71   :  { %p640_p11 = scmp.lt.s32.totalorder %s638_s3, %s634_s13 }
  0x73   :  { %p641_p12 = por %p640_p11, %p639_p10 }
  0x75   :  { %p642_p13 = pnand %p641_p12, %p635_p9 }
  0x77   :  { %645 = shalt.err (!%p642_p13)
}
  0x78   :  { %92 = dma.hbm_to_vmem [thread:$0]  %s857_s6, 16, %s90_s20, [#allocation14]  }
  0x79   :  { %668 = dma.done.wait [#allocation5], 256  }
  0x7a   :  { %669 = vsyncadd [#allocation5], 4294967040 }
  0x7b   :  { %670 = dma.done.wait [#allocation8], 32  }
  0x7c   :  { %671 = vsyncadd [#allocation8], 4294967264 }
  0x7d   :  { %672 = dma.done.wait [#allocation11], 528  }
  0x7e   :  { %673 = vsyncadd [#allocation11], 4294966768 }
  0x7f   :  { %674 = dma.done.wait [#allocation14], 1040  }
  0x80   :  { %675 = vsyncadd [#allocation14], 4294966256  ;;  %vm120_vm0 = vcmask 261120   ;;  %v118_v0 = vld [vmem:[#allocation4] sm:$0xff]  ;;  %v119_v1 = vld [vmem:[#allocation4 + $0x8] sm:$0xff]  ;;  %v687_v50 = vmov 0.0  }
  0x81   :  { %v121_v2 = vsel %vm120_vm0, %v118_v0, 0.0  ;;  %v124_v3 = vsel %vm120_vm0, %v119_v1, 0.0  ;;  %v172_v14 = vld [vmem:[#allocation10] sm:$0xff]  ;;  %v173_v15 = vld [vmem:[#allocation10 + $0x8] sm:$0xff]  ;;  %v174_v17 = vld [vmem:[#allocation10 + $0x10] sm:$0xff]  ;;  %169 = vst.msk [vmem:[#allocation3 + $0x8] sm:$0xff] %vm120_vm0, %v687_v50 }
  0x82   :  { %122 = vadd.xlane.f32.xlu0 %v121_v2  ;;  %v453_v16 = vpack.c.bf16 %v173_v15, %v172_v14  ;;  %v175_v18 = vld [vmem:[#allocation10 + $0x18] sm:$0xff]  ;;  %v269_v20 = vld [vmem:[#allocation13] sm:$0xff]  ;;  %v270_v21 = vld [vmem:[#allocation13 + $0x8] sm:$0xff]  ;;  %168 = vst.msk [vmem:[#allocation3] sm:$0xff] %vm120_vm0, %v687_v50  ;;  %vm277_vm1 = vcmask 523264   ;;  %s688_s6 = smov [#allocation16]  }
  0x83   :  { %v457_v19 = vpack.c.bf16 %v175_v18, %v174_v17  ;;  %v271_v22 = vld [vmem:[#allocation13 + $0x10] sm:$0xff]  ;;  %v461_v23 = vpack.c.bf16 %v270_v21, %v269_v20  ;;  %v272_v24 = vld [vmem:[#allocation13 + $0x18] sm:$0xff]  ;;  %v273_v26 = vld [vmem:[#allocation13 + $0x20] sm:$0xff]  ;;  %s384_s14 = sshll.u32 %s688_s6, 4  ;;  %s385_s14 = int_to_ptr.vmem [resolvable:$true] %s384_s14 }
  0x84   :  { %454 = vmatprep.subr.bf16.mxu0 %v453_v16  ;;  %v465_v25 = vpack.c.bf16 %v272_v24, %v271_v22  ;;  %v274_v27 = vld [vmem:[#allocation13 + $0x28] sm:$0xff]  ;;  %v399_v36 = vld [vmem:[#allocation7] ss:$0 sm:$0xff]  ;;  %v400_v38 = vld [vmem:[#allocation9] ss:$0 sm:$0xff]  ;;  %s646_s15 = scalar_lea.vmem %s385_s14, 256  ;;  %p651_p1 = scmp.lt.s32.totalorder %s385_s14, %s385_s14 }
  0x85   :  { %456 = vmatpush3.bf16.msra.mxu0 %v453_v16  ;;  %462 = vmatprep.subr.bf16.mxu1 %v461_v23  ;;  %v469_v28 = vpack.c.bf16 %v274_v27, %v273_v26  ;;  %v275_v47 = vld [vmem:[#allocation13 + $0x30] sm:$0xff]  ;;  %v276_v48 = vld [vmem:[#allocation13 + $0x38] sm:$0xff]  ;;  %p647_p0 = scmp.ne.s32.totalorder %s385_s14, %s646_s15  ;;  %p652_p2 = scmp.lt.s32.totalorder %s646_s15, %s646_s15 }
  0x86   :  { %125 = vadd.xlane.f32.xlu0 %v124_v3  ;;  %458 = vmatprep.subr.bf16.mxu0 %v457_v19  ;;  %v473_v49 = vpack.c.bf16 %v276_v48, %v275_v47  ;;  %v401_v51 = vld [vmem:[#allocation12] ss:$0 sm:$0xff] }
  0x87   :  { %464 = vmatpush3.bf16.msra.mxu1 %v461_v23  ;;  %p653_p3 = por %p652_p2, %p651_p1 }
  0x88   :  { %466 = vmatprep.subr.bf16.mxu1 %v465_v25  ;;  %v268_v58 = vld [vmem:[#allocation3 + $0x8] sm:$0xff] }
  0x89   :  { %460 = vmatpush3.bf16.msra.mxu0 %v457_v19  ;;  %v267_v59 = vld [vmem:[#allocation3] sm:$0xff]  ;;  %p654_p4 = pnand %p653_p3, %p647_p0 }
  0x8b   :  { %468 = vmatpush3.bf16.msra.mxu1 %v465_v25 }
  0x8c   :  { %470 = vmatprep.subr.bf16.mxu1 %v469_v28 }
  0x8f   :  { %472 = vmatpush3.bf16.msra.mxu1 %v469_v28 }
  0x90   :  { %474 = vmatprep.subr.bf16.mxu1 %v473_v49 }
  0x93   :  { %476 = vmatpush3.bf16.msra.mxu1 %v473_v49 }
 0x10f   :  { %v123_v4 = vpop.xlane.xlu0 %122 }
 0x110   :  { %v128_v5 = vmul.f32 0.03125, %v123_v4 }
 0x112   :  { %v130_v6 = vsub.f32 %v118_v0, %v128_v5  ;;  %v406_v0 = vld [vmem:[#allocation15] ss:$0 sm:$0xff] }
 0x113   :  { %v126_v7 = vpop.xlane.xlu0 %125 }
 0x114   :  { %v129_v8 = vmul.f32 0.03125, %v126_v7  ;;  %v132_v9 = vmul.f32 %v130_v6, %v130_v6 }
 0x116   :  { %v131_v10 = vsub.f32 %v119_v1, %v129_v8  ;;  %v134_v11 = vsel %vm120_vm0, %v132_v9, 0.0 }
 0x117   :  { %135 = vadd.xlane.f32.xlu1 %v134_v11 }
 0x118   :  { %v133_v12 = vmul.f32 %v131_v10, %v131_v10 }
 0x11a   :  { %v137_v13 = vsel %vm120_vm0, %v133_v12, 0.0 }
 0x11b   :  { %138 = vadd.xlane.f32.xlu1 %v137_v13 }
 0x1a4   :  { %v136_v29 = vpop.xlane.xlu1 %135 }
 0x1a5   :  { %v140_v30 = vmul.f32 0.03125, %v136_v29 }
 0x1a7   :  { %v142_v31 = vadd.f32 1e-05, %v140_v30 }
 0x1a8   :  { %v139_v32 = vpop.xlane.xlu1 %138 }
 0x1a9   :  { %488 = vrsqrt.f32 %v142_v31  ;;  %v141_v33 = vmul.f32 0.03125, %v139_v32 }
 0x1ab   :  { %v143_v34 = vadd.f32 1e-05, %v141_v33 }
 0x1ad   :  { %490 = vrsqrt.f32 %v143_v34 }
 0x1b3   :  { %v489_v35 = vpop.eup %488 }
 0x1b4   :  { %v146_v37 = vmul.f32 %v489_v35, %v130_v6 }
 0x1b6   :  { %v155_v39 = vmul.f32 %v399_v36, %v146_v37 }
 0x1b7   :  { %v491_v40 = vpop.eup %490 }
 0x1b8   :  { %v164_v41 = vadd.f32 %v400_v38, %v155_v39  ;;  %v147_v42 = vmul.f32 %v491_v40, %v131_v10 }
 0x1ba   :  { %166 = vst.msk [vmem:[#allocation2] sm:$0xff] %vm120_vm0, %v164_v41  ;;  %v156_v43 = vmul.f32 %v399_v36, %v147_v42 }
 0x1bc   :  { %v165_v44 = vadd.f32 %v400_v38, %v156_v43 }
 0x1be   :  { %167 = vst.msk [vmem:[#allocation2 + $0x8] sm:$0xff] %vm120_vm0, %v165_v44 }
 0x1c1   :  { %v170_v45 = vld [vmem:[#allocation2] sm:$0xff] }
 0x1c2   :  { %431 = vmatprep.mubr.msk.f32.mxu0 %vm120_vm0, %v170_v45 }
 0x1c5   :  { %v171_v46 = vld [vmem:[#allocation2 + $0x8] sm:$0xff] }
 0x1c6   :  { %432 = vmatmul.mubr.msk.f32.vlgmr.msra.gmra.mrb[0].mxu0 %vm120_vm0, %v171_v46 }
 0x299   :  { %v433_v52 = vpop.f32.mrb[0].mxu0 }
 0x29a   :  { %v262_v53 = vadd.f32 %v433_v52, %v401_v51  ;;  %v256_v54 = vpop.f32.mrb[1].mxu0 }
 0x29b   :  { %v257_v55 = vadd.f32 %v401_v51, %v256_v54 }
 0x29c   :  { %v266_v57 = vmax.f32 %v262_v53, 0.0 }
 0x29d   :  { %v265_v56 = vmax.f32 %v257_v55, 0.0 }
 0x29f   :  { %450 = vmatprep.mubr.msk.f32.mxu1 %vm277_vm1, %v265_v56 }
 0x2a0   :  { %451 = vmatmul.mubr.msk.f32.vlgmr.msra.gmra.mrb[0].mxu1 %vm277_vm1, %v266_v57 }
 0x373   :  { %v452_v60 = vpop.f32.mrb[0].mxu1 }
 0x374   :  { %v360_v61 = vadd.f32 %v452_v60, %v268_v58  ;;  %v350_v62 = vpop.f32.mrb[1].mxu1 }
 0x375   :  { %v359_v63 = vadd.f32 %v350_v62, %v267_v59 }
 0x376   :  { %362 = vst.msk [vmem:[#allocation3 + $0x8] sm:$0xff] %vm120_vm0, %v360_v61 }
 0x377   :  { %361 = vst.msk [vmem:[#allocation3] sm:$0xff] %vm120_vm0, %v359_v63 }
 0x37d   :  { %v367_v1 = vld [vmem:[#allocation3 + $0x8] sm:$0xff] }
 0x37e   :  { %v366_v2 = vld [vmem:[#allocation3] sm:$0xff]  ;;  %v376_v3 = vadd.f32 %v406_v0, %v367_v1 }
 0x37f   :  { %v375_v4 = vadd.f32 %v406_v0, %v366_v2 }
 0x380   :  { %378 = vst.msk [vmem:[#allocation16 + $0x8] sm:$0xff] %vm120_vm0, %v376_v3 }
 0x381   :  { %377 = vst.msk [vmem:[#allocation16] sm:$0xff] %vm120_vm0, %v375_v4 }
 0x382   :  { %657 = shalt.err (!%p654_p4)
}
 0x383   :  { %s658_s20 = scalar_lea.hbm %s858_s7, 256 }
 0x384   :  { %p659_p5 = scmp.ne.s32.totalorder %s858_s7, %s658_s20  ;;  %p662_p6 = scmp.lt.u32.totalorder %s658_s20, %s858_s7 }
 0x386   :  { %p664_p7 = pnand %p662_p6, %p659_p5 }
 0x388   :  { %667 = shalt.err (!%p664_p7)
}
 0x389   :  { %390 = dma.vmem_to_hbm [thread:$0]  %s385_s14, 256, %s858_s7, [#allocation6], %s681_s25, %s681_s25, %s682_s26  }
 0x38a   :  { %676 = dma.done.wait [#allocation6], 256  }
 0x38b   :  { %677 = vsyncadd [#allocation6], 4294967040 }
 0x38c   :  { %394 = vsyncpa [#allocation5], 1 }
 0x38d   :  { %395 = vsyncpa [#allocation8], 1 }
 0x38e   :  { %396 = vsyncpa [#allocation11], 1 }
 0x38f   :  { %397 = vsyncpa [#allocation14], 1 }
 0x390   :  { %398 = vsyncpa [#allocation6], 1 }

</bundles_post_ra>
